<compile_context>
chip_gen: v6e
topology: v6e:2x2x1
jax: 0.10.0
libtpu: 0.0.40
codegen_flags: <defaults>
</compile_context>

<pallas_src>
import jax
import jax.numpy as jnp
from jax import lax
from jax.experimental import pallas as pl
from jax.experimental.pallas import tpu as pltpu


# ----------------------------------------------------------------------------
# Kernels
# ----------------------------------------------------------------------------
def _attn_pool_kernel(x_ref, w_ref, o_ref):
    """Single fused pass over a (TB, S, D) tile with the full sequence resident."""
    tb, s, d = x_ref.shape
    xt = x_ref[...]                                   # (TB, S, D) input dtype (no f32 copy)
    w = w_ref[...]                                    # (1, D)     input dtype

    # scores_{b,s} = <x[b,s,:], w> on the MXU, f32 accumulate.  Reshapes only
    # merge/split leading dims (D stays on lanes) so they are layout-free.
    scores = lax.dot_general(
        xt.reshape(tb * s, d), w,
        dimension_numbers=(((1,), (1,)), ((), ())),
        preferred_element_type=jnp.float32,
        precision=lax.Precision.HIGHEST,
    ).reshape(tb, s, 1)                               # (TB, S, 1) f32

    # Numerically stable softmax over S, in f32 (v5e has no bf16 VPU/EUP).
    m = jnp.max(scores, axis=1, keepdims=True)        # (TB, 1, 1)
    e = jnp.exp(scores - m)                           # (TB, S, 1)
    denom = jnp.sum(e, axis=1, keepdims=True)         # (TB, 1, 1)

    # Weighted sum over S on the MXU: (TB,S,1)^T · (TB,S,D) -> (TB,1,D).
    # e is tiny; casting it to the input dtype (no-op for f32) keeps MXU
    # operand dtypes matched and avoids any (TB,S,D)-sized f32 temporary.
    weighted = lax.dot_general(
        e.astype(xt.dtype), xt,
        dimension_numbers=(((1,), (1,)), ((0,), (0,))),
        preferred_element_type=jnp.float32,
        precision=lax.Precision.HIGHEST,
    )                                                 # (TB, 1, D) f32

    # Normalize after the reduction: TB*D multiplies instead of TB*S*D.
    inv = pl.reciprocal(denom, approx=False)          # (TB, 1, 1), EUP
    o_ref[...] = (weighted * inv).reshape(tb, d).astype(o_ref.dtype)


def _attn_pool_flash_kernel(x_ref, w_ref, o_ref, m_sc, l_sc, acc_sc):
    """S-tiled attention pooling with flash-style running (m, l, acc) state."""
    k = pl.program_id(1)
    tb, ts, d = x_ref.shape

    @pl.when(k == 0)
    def _():
        m_sc[...] = jnp.full(m_sc.shape, -jnp.inf, dtype=m_sc.dtype)
        l_sc[...] = jnp.zeros(l_sc.shape, dtype=l_sc.dtype)
        acc_sc[...] = jnp.zeros(acc_sc.shape, dtype=acc_sc.dtype)

    xt = x_ref[...]                                   # (TB, TS, D) input dtype
    w = w_ref[...]                                    # (1, D)

    scores = lax.dot_general(
        xt.reshape(tb * ts, d), w,
        dimension_numbers=(((1,), (1,)), ((), ())),
        preferred_element_type=jnp.float32,
        precision=lax.Precision.HIGHEST,
    ).reshape(tb, ts, 1)                              # (TB, TS, 1) f32

    m_prev = m_sc[...]                                # (TB, 1, 1)
    m_new = jnp.maximum(m_prev, jnp.max(scores, axis=1, keepdims=True))
    alpha = jnp.exp(m_prev - m_new)                   # (TB, 1, 1); 0 at k == 0
    e = jnp.exp(scores - m_new)                       # (TB, TS, 1)

    l_sc[...] = alpha * l_sc[...] + jnp.sum(e, axis=1, keepdims=True)
    partial = lax.dot_general(
        e.astype(xt.dtype), xt,
        dimension_numbers=(((1,), (1,)), ((0,), (0,))),
        preferred_element_type=jnp.float32,
        precision=lax.Precision.HIGHEST,
    )                                                 # (TB, 1, D) f32
    acc_sc[...] = alpha * acc_sc[...] + partial
    m_sc[...] = m_new

    @pl.when(k == pl.num_programs(1) - 1)
    def _():
        inv = pl.reciprocal(l_sc[...], approx=False)  # (TB, 1, 1)
        o_ref[...] = (acc_sc[...] * inv).reshape(tb, d).astype(o_ref.dtype)


# ----------------------------------------------------------------------------
# Tile sizing
# ----------------------------------------------------------------------------
def _sublane_multiple(dtype):
    # Rows per packed 32-bit sublane group: f32 -> 8, bf16 -> 16, int8/fp8 -> 32.
    return max(8, 32 // jnp.dtype(dtype).itemsize)


def _default_vmem_limit_bytes():
    # Raise the scoped-VMEM limit above the 16/32 MiB defaults so multi-MiB,
    # double-buffered tiles compile, but stay well under physical VMEM
    # (v7x: 64 MiB/TC).  Query the chip when possible.
    try:
        cap = int(pltpu.get_tpu_info().vmem_capacity_bytes)
        return min(cap // 2, 64 << 20)
    except Exception:
        return 48 << 20


def _batch_tile_candidates(b, dtype):
    sub = _sublane_multiple(dtype)
    cands = [t for t in range(sub, b + 1, sub) if b % t == 0]
    # Tiny batch: single full-batch block (legal via the block == full-dim rule).
    return cands or [b]


def _pick_batch_tile(b, seq, d, dtype, target_tile_bytes):
    """Largest batch tile whose (tb, seq, d) x-tile stays under the byte budget,
    keeping >= 2 batch grid steps when possible (v7x megacore)."""
    itemsize = jnp.dtype(dtype).itemsize
    row_bytes = seq * d * itemsize
    cands = _batch_tile_candidates(b, dtype)
    fitting = [t for t in cands if t * row_bytes <= target_tile_bytes] or [min(cands)]
    tb = max(fitting)
    if b // tb < 2:
        two_step = [t for t in fitting if b // t >= 2]
        if two_step:
            tb = max(two_step)
    return tb


def _pick_seq_tile(s, tb, d, dtype, target_tile_bytes):
    itemsize = jnp.dtype(dtype).itemsize
    cands = [t for t in range(8, s + 1, 8) if s % t == 0]
    if not cands:
        return s                      # S not 8-tileable: keep full S resident
    fitting = [t for t in cands if tb * t * d * itemsize <= target_tile_bytes]
    return max(fitting) if fitting else min(cands)


# ----------------------------------------------------------------------------
# Public wrapper
# ----------------------------------------------------------------------------
def attention_pooling(x, attention_weights, *, seq_tile=None,
                      target_tile_bytes=None, vmem_limit_bytes=None):
    """Pallas equivalent of AttentionPoolingLayer.forward.

    x:                  (B, S, D)
    attention_weights:  (D,)
    returns:            (B, D)
    """
    b, s, d = x.shape
    assert attention_weights.shape == (d,)
    dtype = x.dtype
    itemsize = jnp.dtype(dtype).itemsize

    if vmem_limit_bytes is None:
        vmem_limit_bytes = _default_vmem_limit_bytes()
    if target_tile_bytes is None:
        # x tile is double-buffered and the kernel adds small f32 intermediates
        # ((TB,S,1) scores/exps, (TB,1,D) acc) -> budget ~1/6 of the limit.
        target_tile_bytes = max(1 << 20, vmem_limit_bytes // 6)

    # Weight as a lane-major (1, D) row in x's dtype so both MXU operands match
    # (mixed-precision behaviour for bf16 inputs, exact for f32).
    w2 = attention_weights.reshape(1, d).astype(dtype)

    cands = _batch_tile_candidates(b, dtype)
    full_seq_fits = min(cands) * s * d * itemsize <= target_tile_bytes

    if seq_tile is None and full_seq_fits:
        # ---- single fused pass, full sequence resident per tile -------------
        tb = _pick_batch_tile(b, s, d, dtype, target_tile_bytes)
        return pl.pallas_call(
            _attn_pool_kernel,
            out_shape=jax.ShapeDtypeStruct((b, d), dtype),
            grid_spec=pltpu.PrefetchScalarGridSpec(
                num_scalar_prefetch=0,
                grid=(b // tb,),
                in_specs=[
                    pl.BlockSpec((tb, s, d), lambda i: (i, 0, 0)),
                    pl.BlockSpec((1, d), lambda i: (0, 0)),   # weights stay in VMEM
                ],
                out_specs=pl.BlockSpec((tb, d), lambda i: (i, 0)),
            ),
            compiler_params=pltpu.CompilerParams(
                dimension_semantics=("parallel",),
                vmem_limit_bytes=vmem_limit_bytes,
            ),
        )(x, w2)

    # ---- flash-style S-tiled path (long sequences / large D) ----------------
    tb = _pick_batch_tile(b, min(s, 8), d, dtype, target_tile_bytes)
    ts = seq_tile if seq_tile is not None else _pick_seq_tile(
        s, tb, d, dtype, target_tile_bytes)
    assert s % ts == 0 and (ts % 8 == 0 or ts == s), (s, ts)

    return pl.pallas_call(
        _attn_pool_flash_kernel,
        out_shape=jax.ShapeDtypeStruct((b, d), dtype),
        grid_spec=pltpu.PrefetchScalarGridSpec(
            num_scalar_prefetch=0,
            grid=(b // tb, s // ts),
            in_specs=[
                pl.BlockSpec((tb, ts, d), lambda i, k: (i, k, 0)),
                pl.BlockSpec((1, d), lambda i, k: (0, 0)),
            ],
            out_specs=pl.BlockSpec((tb, d), lambda i, k: (i, 0)),
            scratch_shapes=[
                pltpu.VMEM((tb, 1, 1), jnp.float32),   # running max  m
                pltpu.VMEM((tb, 1, 1), jnp.float32),   # running sum  l
                pltpu.VMEM((tb, 1, d), jnp.float32),   # running weighted sum
            ],
        ),
        compiler_params=pltpu.CompilerParams(
            dimension_semantics=("parallel", "arbitrary"),
            vmem_limit_bytes=vmem_limit_bytes,
        ),
    )(x, w2)


# ----------------------------------------------------------------------------
# Reference + self-test
# ----------------------------------------------------------------------------
def _reference(x, w):
    scores = jnp.sum(x * w[None, None, :], axis=-1, keepdims=True)   # (B, S, 1)
    p = jax.nn.softmax(scores, axis=1)                                # (B, S, 1)
    return jnp.sum(x * p, axis=1)                                     # (B, D)


if __name__ == "__main__":
    key = jax.random.PRNGKey(0)
    k_x, k_w, k_x2, k_w2 = jax.random.split(key, 4)

    # Small shapes implied by the module's forward: (batch, seq, hidden).
    B, S, D = 2, 8, 32
    x = jax.random.normal(k_x, (B, S, D), dtype=jnp.float32)
    w = jax.random.normal(k_w, (D,), dtype=jnp.float32)

    out = jax.block_until_ready(attention_pooling(x, w))
    ref = jax.block_until_ready(_reference(x, w))
    assert out.shape == (B, D), out.shape
    assert jnp.allclose(out, ref, atol=1e-5, rtol=1e-5), float(jnp.max(jnp.abs(out - ref)))

    # Also exercise the S-tiled flash-style path (forced via seq_tile).
    B2, S2, D2 = 16, 64, 128
    x2 = jax.random.normal(k_x2, (B2, S2, D2), dtype=jnp.float32)
    w2 = jax.random.normal(k_w2, (D2,), dtype=jnp.float32)
    out2 = jax.block_until_ready(attention_pooling(x2, w2, seq_tile=16))
    ref2 = jax.block_until_ready(_reference(x2, w2))
    assert out2.shape == (B2, D2), out2.shape
    assert jnp.allclose(out2, ref2, atol=1e-5, rtol=1e-5), float(jnp.max(jnp.abs(out2 - ref2)))

    print("KERNEL_OK")
</pallas_src>

<mosaic_0001>
module attributes {stable_mosaic.version = 11 : i64} {
  func.func @_attn_pool_kernel(%arg0: i32, %arg1: memref<2x8x32xf32, #tpu.memory_space<vmem>>, %arg2: memref<1x32xf32, #tpu.memory_space<vmem>>, %arg3: memref<2x32xf32, #tpu.memory_space<vmem>>) attributes {dimension_semantics = [#tpu.dimension_semantics<parallel>], iteration_bounds = array<i64: 1>, scalar_prefetch = 0 : i64, scratch_operands = 0 : i64, tpu.core_type = #tpu.core_type<tc>, window_params = [{transform_indices = @transform_0, window_bounds = array<i64: 2, 8, 32>}, {pipeline_mode = #tpu.pipeline_mode<synchronous>, transform_indices = @transform_1, window_bounds = array<i64: 1, 32>}, {transform_indices = @transform_2, window_bounds = array<i64: 2, 32>}]} {
    %c0 = arith.constant 0 : index
    %c0_0 = arith.constant 0 : index
    %c0_1 = arith.constant 0 : index
    %0 = vector.load %arg1[%c0, %c0_0, %c0_1] : memref<2x8x32xf32, #tpu.memory_space<vmem>>, vector<2x8x32xf32>
    %c0_2 = arith.constant 0 : index
    %c0_3 = arith.constant 0 : index
    %1 = vector.load %arg2[%c0_2, %c0_3] : memref<1x32xf32, #tpu.memory_space<vmem>>, vector<1x32xf32>
    %2 = vector.shape_cast %0 : vector<2x8x32xf32> to vector<16x32xf32>
    %cst = arith.constant dense<0.000000e+00> : vector<16x1xf32>
    %3 = tpu.matmul %2, %1, %cst {dimension_numbers = #tpu.dot_dimension_numbers<[1], [1], [0], [0], [0, 0, 1, 0], [], []>, precision = #tpu.contract_precision<fp32>} : vector<16x32xf32>, vector<1x32xf32>, vector<16x1xf32> -> vector<16x1xf32>
    %4 = vector.shape_cast %3 : vector<16x1xf32> to vector<2x8x1xf32>
    %cst_4 = arith.constant dense<0xFF800000> : vector<2x1xf32>
    %5 = vector.multi_reduction <maximumf>, %4, %cst_4 [1] : vector<2x8x1xf32> to vector<2x1xf32>
    %6 = vector.shape_cast %5 : vector<2x1xf32> to vector<2x1x1xf32>
    %7 = vector.broadcast %6 : vector<2x1x1xf32> to vector<2x8x1xf32>
    %8 = arith.subf %4, %7 : vector<2x8x1xf32>
    %9 = math.exp %8 : vector<2x8x1xf32>
    %cst_5 = arith.constant dense<0.000000e+00> : vector<2x1xf32>
    %10 = vector.multi_reduction <add>, %9, %cst_5 [1] : vector<2x8x1xf32> to vector<2x1xf32>
    %11 = vector.shape_cast %10 : vector<2x1xf32> to vector<2x1x1xf32>
    %cst_6 = arith.constant dense<0.000000e+00> : vector<2x1x32xf32>
    %12 = tpu.matmul %9, %0, %cst_6 {dimension_numbers = #tpu.dot_dimension_numbers<[1], [1], [2], [2], [0, 0, 0, 2, 1, 2], [0], [0]>, precision = #tpu.contract_precision<fp32>} : vector<2x8x1xf32>, vector<2x8x32xf32>, vector<2x1x32xf32> -> vector<2x1x32xf32>
    %13 = tpu.reciprocal %11 : vector<2x1x1xf32> -> vector<2x1x1xf32>
    %14 = vector.broadcast %13 : vector<2x1x1xf32> to vector<2x1x32xf32>
    %15 = arith.mulf %12, %14 : vector<2x1x32xf32>
    %16 = vector.shape_cast %15 : vector<2x1x32xf32> to vector<2x32xf32>
    %c0_7 = arith.constant 0 : index
    %c0_8 = arith.constant 0 : index
    %17 = vector.load %arg3[%c0_7, %c0_8] : memref<2x32xf32, #tpu.memory_space<vmem>>, vector<2x32xf32>
    tpu.vector_store %arg3[%c0_7, %c0_8], %16 {strides = array<i32>} : memref<2x32xf32, #tpu.memory_space<vmem>>, vector<2x32xf32>,
    return
  }
  func.func @transform_0(%arg0: i32) -> (i32, i32, i32) {
    %c0_i32 = arith.constant 0 : i32
    %c0_i32_0 = arith.constant 0 : i32
    %c0_i32_1 = arith.constant 0 : i32
    return %arg0, %c0_i32, %c0_i32_0 : i32, i32, i32
  }
  func.func @transform_1(%arg0: i32) -> (i32, i32) {
    %c0_i32 = arith.constant 0 : i32
    %c0_i32_0 = arith.constant 0 : i32
    %c0_i32_1 = arith.constant 0 : i32
    return %c0_i32, %c0_i32_0 : i32, i32
  }
  func.func @transform_2(%arg0: i32) -> (i32, i32) {
    %c0_i32 = arith.constant 0 : i32
    %c0_i32_0 = arith.constant 0 : i32
    return %arg0, %c0_i32 : i32, i32
  }
}

</mosaic_0001>

<bundles_post_ra>
// kernel: tpu_custom_call.1
= control target key start
LH: loop header
LB: loop body
LE: loop exit
PB: predicated region body
PF: predicated region fallthrough
CT: control target
= control target key end

     0   :  { %7 = vsyncpa [#allocation3], 0  ;;  %s1283_s0 = inlined_call_operand.hbm [shape: f32[2,8,32], index: 0, kind: input, shape index: {}]   ;;  %s1284_s1 = inlined_call_operand.vmem [shape: f32[1,32], index: 1, kind: input, shape index: {}]   ;;  %s1285_s2 = inlined_call_operand.hbm [shape: f32[2,32], index: 2, kind: output, shape index: {}]  }
   0x1   :  { %8 = vsyncpa [#allocation4], 0  ;;  %s1207_s9 = smov [#allocation2]  }
   0x2   :  { %s14_s10 = sshll.u32 %s1207_s9, 4  ;;  %s15_s10 = int_to_ptr.vmem [resolvable:$true] %s14_s10 }
   0x3   :  { %s1171_s11 = scalar_lea.vmem %s15_s10, 256  ;;  %p1176_p1 = scmp.lt.s32.totalorder %s15_s10, %s15_s10 }
   0x4   :  { %p1172_p0 = scmp.ne.s32.totalorder %s15_s10, %s1171_s11  ;;  %p1177_p2 = scmp.lt.s32.totalorder %s1171_s11, %s1171_s11 }
   0x6   :  { %p1178_p3 = por %p1177_p2, %p1176_p1 }
   0x8   :  { %p1179_p4 = pnand %p1178_p3, %p1172_p0 }
   0xa   :  { %1182 = shalt.err (!%p1179_p4)
}
   0xb   :  { %s1208_s12 = smov 128   ;;  %s1209_s13 = smov 8  }
   0xc   :  { %20 = dma.hbm_to_vmem [thread:$0]  %s1283_s0, 256, %s15_s10, [#allocation3], %s1208_s12, %s1208_s12, %s1209_s13  }
   0xd   :  { %1203 = dma.done.wait [#allocation3], 256  }
   0xe   :  { %1204 = vsyncadd [#allocation3], 4294967040  ;;  %v26_v0 = vld [vmem:[#allocation2] sm:$0xff]  ;;  %vm37_vm0 = vcmask 261120   ;;  %v27_v2 = vld [vmem:[#allocation2 + $0x8] sm:$0xff]  ;;  %v1210_v30 = vmov 0.0  }
   0xf   :  { %v1064_v1 = vld [vmem:[%s1284_s1] ss:$0 sm:$0xff]  ;;  %v141_v23 = vand.u32 4294901760, %v26_v0  ;;  %1094 = vmatprep.subr.mxu1 %v1210_v30  ;;  %1089 = vmatprep.subr.mxu0 %v1210_v30  ;;  %vm1211_vm1 = vmmov 0   ;;  %v622_v33 = vand.u32 4294901760, %v27_v2  ;;  %vm106_vm2 = vcmask 64512  }
  0x10   :  { %v35_v3 = vmul.f32 %v1064_v1, %v26_v0  ;;  %v36_v4 = vmul.f32 %v1064_v1, %v27_v2  ;;  %1096 = vmatprep.mubr.msk.f32.mxu1 %vm1211_vm1, %v1210_v30  ;;  %1091 = vmatprep.mubr.msk.f32.mxu0 %vm1211_vm1, %v1210_v30  ;;  %s1212_s0 = smov [#allocation5]   ;;  %vm1044_vm3 = vcmask 1041409   ;;  %vm1047_vm4 = vcmask 254976  }
  0x11   :  { %v218_v26 = vsub.f32 %v26_v0, %v141_v23  ;;  %1090 = vmatpush3.msra.mxu0 %v141_v23  ;;  %v699_v34 = vsub.f32 %v27_v2, %v622_v33  ;;  %s1055_s1 = sshll.u32 %s1212_s0, 4  ;;  %s1056_s1 = int_to_ptr.vmem [resolvable:$true] %s1055_s1 }
  0x12   :  { %v38_v5 = vsel %vm37_vm0, %v35_v3, 0.0  ;;  %v41_v6 = vsel %vm37_vm0, %v36_v4, 0.0  ;;  %1099 = vmatprep.subr.mxu0 %v1210_v30  ;;  %s1183_s18 = scalar_lea.vmem %s1056_s1, 32  ;;  %p1188_p6 = scmp.lt.s32.totalorder %s1056_s1, %s1056_s1 }
  0x13   :  { %39 = vadd.xlane.f32.xlu0 %v38_v5  ;;  %v219_v27 = vand.u32 4294901760, %v218_v26  ;;  %v700_v38 = vand.u32 4294901760, %v699_v34  ;;  %p1184_p5 = scmp.ne.s32.totalorder %s1056_s1, %s1183_s18  ;;  %p1189_p7 = scmp.lt.s32.totalorder %s1183_s18, %s1183_s18 }
  0x15   :  { %v220_v28 = vsub.f32 %v218_v26, %v219_v27  ;;  %v701_v44 = vsub.f32 %v699_v34, %v700_v38  ;;  %p1190_p8 = por %p1189_p7, %p1188_p6 }
  0x17   :  { %42 = vadd.xlane.f32.xlu0 %v41_v6  ;;  %v221_v29 = vand.u32 4294901760, %v220_v28  ;;  %v702_v48 = vand.u32 4294901760, %v701_v44  ;;  %p1191_p9 = pnand %p1190_p8, %p1184_p5 }
  0x19   :  { %1095 = vmatpush3.msra.mxu1 %v221_v29 }
  0x1a   :  { %1104 = vmatprep.subr.mxu1 %v1210_v30 }
  0x9c   :  { %v40_v7 = vpop.xlane.xlu0 %39 }
  0x9d   :  { %v44_v8 = vrot.slane %v40_v7, 4 }
  0x9f   :  { %v45_v9 = vmax.f32 %v40_v7, %v44_v8 }
  0xa0   :  { %v43_v10 = vpop.xlane.xlu0 %42 }
  0xa1   :  { %v46_v11 = vrot.slane %v45_v9, 2  ;;  %v50_v12 = vrot.slane %v43_v10, 4 }
  0xa3   :  { %v47_v13 = vmax.f32 %v45_v9, %v46_v11  ;;  %v51_v14 = vmax.f32 %v43_v10, %v50_v12 }
  0xa5   :  { %v48_v15 = vrot.slane %v47_v13, 1  ;;  %v52_v16 = vrot.slane %v51_v14, 2 }
  0xa7   :  { %v49_v17 = vmax.f32 %v47_v13, %v48_v15  ;;  %v53_v18 = vmax.f32 %v51_v14, %v52_v16 }
  0xa9   :  { %v56_v19 = vsub.f32 %v40_v7, %v49_v17  ;;  %v54_v20 = vrot.slane %v53_v18, 1 }
  0xab   :  { %v58_v21 = vmul.f32 1.442695, %v56_v19  ;;  %v55_v22 = vmax.f32 %v53_v18, %v54_v20 }
  0xad   :  { %1155 = vpow2.f32 %v58_v21  ;;  %v57_v24 = vsub.f32 %v43_v10, %v55_v22 }
  0xaf   :  { %v60_v25 = vmul.f32 1.442695, %v57_v24 }
  0xb1   :  { %1157 = vpow2.f32 %v60_v25 }
  0xba   :  { %v1236_v31 = vpop.eup %1155 }
  0xbb   :  { %74 = vxpose.xlu1.b32.start.end [1/1] (short) (narrow) %v1236_v31, 8  ;;  %v62_v53 = vrot.slane %v1236_v31, 4 }
  0xbd   :  { %v63_v56 = vadd.f32 %v1236_v31, %v62_v53 }
  0xbe   :  { %v1245_v32 = vpop.eup %1157 }
  0xbf   :  { %556 = vxpose.xlu1.b32.start.end [1/1] (short) (narrow) %v1245_v32, 8  ;;  %v68_v52 = vrot.slane %v1245_v32, 4  ;;  %v64_v60 = vrot.slane %v63_v56, 2 }
  0xc1   :  { %v69_v54 = vadd.f32 %v1245_v32, %v68_v52  ;;  %v65_v1 = vadd.f32 %v64_v60, %v63_v56 }
  0xc3   :  { %v70_v58 = vrot.slane %v69_v54, 2  ;;  %v66_v7 = vrot.slane %v65_v1, 1 }
  0xc5   :  { %v71_v62 = vadd.f32 %v70_v58, %v69_v54  ;;  %v67_v14 = vadd.f32 %v66_v7, %v65_v1 }
  0xc7   :  { %v72_v4 = vrot.slane %v71_v62, 1 }
  0xc9   :  { %v73_v10 = vadd.f32 %v72_v4, %v71_v62 }
  0xcb   :  { %1159 = vrcp.f32 %v73_v10 }
  0xcc   :  { %1161 = vrcp.f32 %v67_v14 }
 0x137   :  { %v90_v35 = vpop.trf.xlu1 }
 0x138   :  { %v108_v36 = vsel %vm106_vm2, %v90_v35, 0 }
 0x139   :  { %v176_v37 = vand.u32 4294901760, %v108_v36 }
 0x13b   :  { %v177_v39 = vsub.f32 %v108_v36, %v176_v37  ;;  %1097 = vmatmul.mubr.f32.vlgmr.msra.gmra.mxu1 %v176_v37  ;;  %v572_v40 = vpop.trf.xlu1 }
 0x13c   :  { %1105 = vmatpush3.msra.mxu1 %v141_v23  ;;  %1106 = vmatprep.mubr.msk.f32.mxu1 %vm1211_vm1, %v1210_v30  ;;  %v589_v41 = vsel %vm106_vm2, %v572_v40, 0 }
 0x13d   :  { %v178_v42 = vand.u32 4294901760, %v177_v39  ;;  %v657_v43 = vand.u32 4294901760, %v589_v41  ;;  %1114 = vmatprep.subr.mxu1 %v1210_v30 }
 0x13f   :  { %1107 = vmatmul.mubr.f32.vlgmr.msra.gmra.mxu1 %v178_v42  ;;  %v179_v45 = vsub.f32 %v177_v39, %v178_v42  ;;  %v658_v46 = vsub.f32 %v589_v41, %v657_v43 }
 0x140   :  { %1115 = vmatpush3.msra.mxu1 %v141_v23  ;;  %1116 = vmatprep.mubr.msk.f32.mxu1 %vm1211_vm1, %v1210_v30 }
 0x141   :  { %v180_v47 = vand.u32 4294901760, %v179_v45  ;;  %1124 = vmatprep.subr.mxu1 %v1210_v30  ;;  %v659_v49 = vand.u32 4294901760, %v658_v46 }
 0x143   :  { %1092 = vmatmul.mubr.f32.vlgmr.msra.gmra.mxu0 %v180_v47  ;;  %1117 = vmatmul.mubr.f32.vlgmr.msra.gmra.mxu1 %v176_v37  ;;  %v660_v50 = vsub.f32 %v658_v46, %v659_v49 }
 0x144   :  { %1100 = vmatpush3.msra.mxu0 %v218_v26  ;;  %1101 = vmatprep.mubr.msk.f32.mxu0 %vm1211_vm1, %v1210_v30 }
 0x145   :  { %1109 = vmatprep.subr.mxu0 %v1210_v30  ;;  %1125 = vmatpush3.msra.mxu1 %v702_v48  ;;  %v661_v51 = vand.u32 4294901760, %v660_v50 }
 0x146   :  { %1126 = vmatprep.mubr.msk.f32.mxu1 %vm1211_vm1, %v1210_v30  ;;  %1134 = vmatprep.subr.mxu1 %v1210_v30 }
 0x147   :  { %1102 = vmatmul.mubr.f32.vlgmr.msra.gmra.mxu0 %v177_v39  ;;  %1127 = vmatmul.mubr.f32.vlgmr.msra.gmra.mxu1 %v657_v43 }
 0x148   :  { %1110 = vmatpush3.msra.mxu0 %v219_v27  ;;  %1111 = vmatprep.mubr.msk.f32.mxu0 %vm1211_vm1, %v1210_v30 }
 0x149   :  { %1119 = vmatprep.subr.mxu0 %v1210_v30  ;;  %1135 = vmatpush3.msra.mxu1 %v622_v33 }
 0x14a   :  { %1136 = vmatprep.mubr.msk.f32.mxu1 %vm1211_vm1, %v1210_v30  ;;  %1144 = vmatprep.subr.mxu1 %v1210_v30 }
 0x14b   :  { %1112 = vmatmul.mubr.f32.vlgmr.msra.gmra.mxu0 %v176_v37  ;;  %1137 = vmatmul.mubr.f32.vlgmr.msra.gmra.mxu1 %v659_v49 }
 0x14c   :  { %1120 = vmatpush3.msra.mxu0 %v622_v33  ;;  %1121 = vmatprep.mubr.msk.f32.mxu0 %vm1211_vm1, %v1210_v30 }
 0x14d   :  { %1129 = vmatprep.subr.mxu0 %v1210_v30  ;;  %1145 = vmatpush3.msra.mxu1 %v622_v33 }
 0x14e   :  { %1146 = vmatprep.mubr.msk.f32.mxu1 %vm1211_vm1, %v1210_v30 }
 0x14f   :  { %1122 = vmatmul.mubr.f32.vlgmr.msra.gmra.mxu0 %v661_v51  ;;  %1147 = vmatmul.mubr.f32.vlgmr.msra.gmra.mxu1 %v657_v43 }
 0x150   :  { %1130 = vmatpush3.msra.mxu0 %v699_v34  ;;  %1131 = vmatprep.mubr.msk.f32.mxu0 %vm1211_vm1, %v1210_v30  ;;  %v1160_v34 = vpop.eup %1159 }
 0x151   :  { %1139 = vmatprep.subr.mxu0 %v1210_v30  ;;  %v1162_v36 = vpop.eup %1161 }
 0x153   :  { %1132 = vmatmul.mubr.f32.vlgmr.msra.gmra.mxu0 %v658_v46 }
 0x154   :  { %1140 = vmatpush3.msra.mxu0 %v700_v38  ;;  %1141 = vmatprep.mubr.msk.f32.mxu0 %vm1211_vm1, %v1210_v30 }
 0x157   :  { %1142 = vmatmul.mubr.f32.vlgmr.msra.gmra.mxu0 %v657_v43 }
 0x1fb   :  { %v258_v55 = vpop.f32.mrf.mxu1 }
 0x1fd   :  { %v1098_v57 = vpop.f32.mrf.mxu1 }
 0x1ff   :  { %v406_v59 = vpop.f32.mrf.mxu1 }
 0x201   :  { %v1108_v61 = vpop.f32.mrf.mxu1 }
 0x203   :  { %v182_v63 = vpop.f32.mrf.mxu0  ;;  %v552_v0 = vpop.f32.mrf.mxu1 }
 0x204   :  { %v259_v13 = vadd.f32 %v258_v55, %v182_v63 }
 0x205   :  { %v1093_v2 = vpop.f32.mrf.mxu0  ;;  %v1118_v3 = vpop.f32.mrf.mxu1 }
 0x207   :  { %v332_v5 = vpop.f32.mrf.mxu0  ;;  %v739_v6 = vpop.f32.mrf.mxu1 }
 0x208   :  { %v333_v17 = vadd.f32 %v332_v5, %v259_v13 }
 0x209   :  { %v1103_v8 = vpop.f32.mrf.mxu0  ;;  %v1128_v9 = vpop.f32.mrf.mxu1 }
 0x20a   :  { %v407_v22 = vadd.f32 %v406_v59, %v333_v17 }
 0x20b   :  { %v480_v11 = vpop.f32.mrf.mxu0  ;;  %v887_v12 = vpop.f32.mrf.mxu1 }
 0x20c   :  { %v481_v27 = vadd.f32 %v480_v11, %v407_v22 }
 0x20d   :  { %v1113_v15 = vpop.f32.mrf.mxu0  ;;  %v1138_v16 = vpop.f32.mrf.mxu1 }
 0x20e   :  { %v553_v32 = vadd.f32 %v552_v0, %v481_v27 }
 0x20f   :  { %v663_v18 = vpop.f32.mrf.mxu0  ;;  %v1033_v19 = vpop.f32.mrf.mxu1 }
 0x210   :  { %v740_v23 = vadd.f32 %v739_v6, %v663_v18  ;;  %v1039_v37 = vmul.f32 %v1162_v36, %v553_v32 }
 0x211   :  { %v1123_v20 = vpop.f32.mrf.mxu0  ;;  %v1148_v21 = vpop.f32.mrf.mxu1 }
 0x213   :  { %v813_v24 = vpop.f32.mrf.mxu0 }
 0x214   :  { %v814_v25 = vadd.f32 %v813_v24, %v740_v23 }
 0x215   :  { %v1133_v26 = vpop.f32.mrf.mxu0 }
 0x216   :  { %v888_v28 = vadd.f32 %v887_v12, %v814_v25 }
 0x217   :  { %v961_v29 = vpop.f32.mrf.mxu0 }
 0x218   :  { %v962_v30 = vadd.f32 %v961_v29, %v888_v28 }
 0x219   :  { %v1143_v31 = vpop.f32.mrf.mxu0 }
 0x21a   :  { %v1034_v33 = vadd.f32 %v1033_v19, %v962_v30 }
 0x21c   :  { %v1040_v35 = vmul.f32 %v1160_v34, %v1034_v33 }
 0x21e   :  { %v1043_v38 = vrot.slane %v1040_v35, 7 }
 0x220   :  { %v1045_v39 = vsel %vm1044_vm3, %v1043_v38, %v1039_v37 }
 0x221   :  { %1048 = vst.msk [vmem:[#allocation5] sm:$0x3] %vm1047_vm4, %v1045_v39 }
 0x222   :  { %1194 = shalt.err (!%p1191_p9)
}
 0x223   :  { %1058 = dma.vmem_to_hbm [thread:$0]  %s1056_s1, 32, %s1285_s2, [#allocation4]  }
 0x224   :  { %1205 = dma.done.wait [#allocation4], 32  }
 0x225   :  { %1206 = vsyncadd [#allocation4], 4294967264 }
 0x226   :  { %1062 = vsyncpa [#allocation3], 1 }
 0x227   :  { %1063 = vsyncpa [#allocation4], 1 }

</bundles_post_ra>
